<compile_context>
chip_gen: v7x
topology: tpu7x:2x2x1
jax: 0.10.0
libtpu: 0.0.40
codegen_flags: <defaults>
</compile_context>

<pallas_src>
import functools

import jax
import jax.numpy as jnp
from jax import lax
from jax.experimental import pallas as pl
from jax.experimental.pallas import tpu as pltpu

LN_EPS = 1e-5
_MASK_VAL = -1e30


def _vmem_limit_bytes():
    # ~75% of physical VMEM; conservative fallback if the query is unavailable.
    try:
        return int(pltpu.get_tpu_info().vmem_capacity_bytes) * 3 // 4
    except Exception:
        return 64 * 1024 * 1024


def _layernorm(x, gamma, beta, eps=LN_EPS):
    mean = jnp.mean(x, axis=-1, keepdims=True)
    var = jnp.mean(jnp.square(x - mean), axis=-1, keepdims=True)
    return (x - mean) * lax.rsqrt(var + eps) * gamma + beta


def _pick_tile(n, pref):
    for t in (pref, 1024, 512, 256, 128, 64, 32, 16, 8):
        if t <= n and n % t == 0:
            return t
    return n


# --------------------- kernel 1: norm1 + fused QKV projection ----------------
def _qkv_kernel(x_ref, n1g_ref, n1b_ref, wqkv_ref, bqkv_ref,
                q_ref, k_ref, v_ref, *, d_model, kv_dim, compute_dtype):
    x = x_ref[...].astype(jnp.float32)
    h = _layernorm(x, n1g_ref[...], n1b_ref[...]).astype(compute_dtype)
    # single MXU pass against [wq | wk | wv]
    qkv = jnp.dot(h, wqkv_ref[...], preferred_element_type=jnp.float32) + bqkv_ref[...]
    q_ref[...] = qkv[:, :d_model].astype(q_ref.dtype)
    k_ref[...] = qkv[:, d_model:d_model + kv_dim].astype(k_ref.dtype)
    v_ref[...] = qkv[:, d_model + kv_dim:].astype(v_ref.dtype)


# -------------------- kernel 2: grouped flash attention ----------------------
def _flash_kernel(q_ref, k_ref, v_ref, o_ref, m_ref, l_ref, acc_ref, *,
                  scale, nhead, groups, head_dim, q_tile, kv_tile,
                  is_causal, approx_recip):
    j = pl.program_id(2)

    @pl.when(j == 0)
    def _():
        m_ref[...] = jnp.full_like(m_ref, _MASK_VAL)
        l_ref[...] = jnp.zeros_like(l_ref)
        acc_ref[...] = jnp.zeros_like(acc_ref)

    def make_step(masked, q_start):
        def step():
            if masked:
                # built once per tile and shared by all heads
                row = lax.broadcasted_iota(jnp.int32, (q_tile, kv_tile), 0) + q_start
                col = lax.broadcasted_iota(jnp.int32, (q_tile, kv_tile), 1) + j * kv_tile
                keep = col <= row
            for qh in range(nhead):
                kvh = qh // groups
                qc = slice(qh * head_dim, (qh + 1) * head_dim)
                kc = slice(kvh * head_dim, (kvh + 1) * head_dim)
                q_h = q_ref[:, qc]
                k_h = k_ref[:, kc]
                v_h = v_ref[:, kc]
                # contract head_dim of q and k directly (no k transpose)
                s = lax.dot_general(q_h, k_h, (((1,), (1,)), ((), ())),
                                    preferred_element_type=jnp.float32) * scale
                if masked:
                    s = jnp.where(keep, s, _MASK_VAL)
                m_prev = m_ref[:, qh:qh + 1]
                m_new = jnp.maximum(m_prev, jnp.max(s, axis=-1, keepdims=True))
                alpha = jnp.exp(m_prev - m_new)
                p = jnp.exp(s - m_new)
                l_ref[:, qh:qh + 1] = (alpha * l_ref[:, qh:qh + 1]
                                       + jnp.sum(p, axis=-1, keepdims=True))
                acc_ref[qh] = alpha * acc_ref[qh] + jnp.dot(
                    p.astype(v_ref.dtype), v_h, preferred_element_type=jnp.float32)
                m_ref[:, qh:qh + 1] = m_new
        return step

    if is_causal:
        i = pl.program_id(1)
        q_start = i * q_tile
        q_end = q_start + q_tile - 1
        kv_first = j * kv_tile
        kv_last = kv_first + kv_tile - 1
        # fully-visible tiles: no mask arithmetic
        pl.when(kv_last <= q_start)(make_step(False, q_start))
        # diagonal tiles: apply the causal mask
        pl.when(jnp.logical_and(kv_first <= q_end, kv_last > q_start))(
            make_step(True, q_start))
        # fully-future tiles fall through; their K/V DMA is already skipped via
        # the clamped index_map in the wrapper.
    else:
        make_step(False, 0)()

    @pl.when(j == pl.num_programs(2) - 1)
    def _():
        outs = []
        for qh in range(nhead):
            inv = pl.reciprocal(l_ref[:, qh:qh + 1], approx=approx_recip)
            outs.append(acc_ref[qh] * inv)
        # single lane-dense store of the whole (tq, D) block
        o_ref[...] = jnp.concatenate(outs, axis=-1).astype(o_ref.dtype)


# ------- kernel 3: attn LayerNorm + out_proj + residual fused with FFN -------
def _out_ffn_kernel(x_ref, a_ref, ang_ref, anb_ref, wo_ref, bo_ref,
                    n2g_ref, n2b_ref, w1_ref, b1_ref, g3_ref, w2_ref,
                    gw2_ref, bw2_ref, out_ref,
                    x1_ref, xln_ref, ssum_ref, ssq_ref, acc_ref,
                    *, ff_dim, compute_dtype):
    j = pl.program_id(2)

    @pl.when(j == 0)
    def _():
        # MultiheadGQA: LayerNorm over concatenated heads, out_proj, residual,
        # then norm2 of the FFN block — all kept in VMEM (no x1 HBM round trip)
        a = _layernorm(a_ref[...].astype(jnp.float32), ang_ref[...], anb_ref[...])
        y = jnp.dot(a.astype(compute_dtype), wo_ref[...],
                    preferred_element_type=jnp.float32) + bo_ref[...]
        x1 = x_ref[...].astype(jnp.float32) + y
        x1_ref[...] = x1
        xln_ref[...] = _layernorm(x1, n2g_ref[...], n2b_ref[...]).astype(xln_ref.dtype)
        ssum_ref[...] = jnp.zeros_like(ssum_ref)
        ssq_ref[...] = jnp.zeros_like(ssq_ref)
        acc_ref[...] = jnp.zeros_like(acc_ref)

    # one dim_feedforward tile: h = relu(ln2(x1) @ w1_tile + b1_tile)
    h = jnp.dot(xln_ref[...], w1_ref[...],
                preferred_element_type=jnp.float32) + b1_ref[...]
    h = jnp.maximum(h, 0.0)
    ssum_ref[...] += jnp.sum(h, axis=-1, keepdims=True)
    ssq_ref[...] += jnp.sum(h * h, axis=-1, keepdims=True)
    hg = (h * g3_ref[...]).astype(compute_dtype)
    acc_ref[...] += jnp.dot(hg, w2_ref[...], preferred_element_type=jnp.float32)

    @pl.when(j == pl.num_programs(2) - 1)
    def _():
        # norm3 folded: ((h - mu)/sigma * g3 + b3) @ w2 + b2
        #             = (acc - mu*(g3@w2)) / sigma + (b3@w2 + b2)
        # NOTE: single-pass variance in f32; clamped at 0 (see review notes).
        mu = ssum_ref[...] * (1.0 / ff_dim)
        var = jnp.maximum(ssq_ref[...] * (1.0 / ff_dim) - mu * mu, 0.0)
        inv = lax.rsqrt(var + LN_EPS)
        y = acc_ref[...] * inv - (mu * inv) * gw2_ref[...] + bw2_ref[...]
        out_ref[...] = (x1_ref[...] + y).astype(out_ref.dtype)


# ------------------------------ parameter prep --------------------------------
def prepare_params(params, compute_dtype=jnp.bfloat16):
    """One-time prep: cast weights to the matmul compute dtype, fuse the Q/K/V
    projection weights, and pre-fold norm3 gamma/beta through w2.  Doing this
    once avoids re-reading every weight from HBM on each forward call."""
    cd = compute_dtype
    f32 = jnp.float32
    w2f = params["w2"].astype(f32)
    return {
        "compute_dtype": cd,
        "d_model": params["wq"].shape[0],
        "kv_dim": params["wk"].shape[1],
        "ff_dim": params["w1"].shape[1],
        "n1g": params["n1g"].astype(f32), "n1b": params["n1b"].astype(f32),
        "wqkv": jnp.concatenate([params["wq"], params["wk"], params["wv"]],
                                axis=1).astype(cd),
        "bqkv": jnp.concatenate([params["bq"], params["bk"], params["bv"]],
                                axis=1).astype(f32),
        "ang": params["ang"].astype(f32), "anb": params["anb"].astype(f32),
        "wo": params["wo"].astype(cd), "bo": params["bo"].astype(f32),
        "n2g": params["n2g"].astype(f32), "n2b": params["n2b"].astype(f32),
        "w1": params["w1"].astype(cd), "b1": params["b1"].astype(f32),
        "n3g": params["n3g"].astype(f32),
        "w2": params["w2"].astype(cd),
        "gw2": (params["n3g"].astype(f32) @ w2f).reshape(1, -1),
        "bw2": (params["n3b"].astype(f32) @ w2f
                + params["b2"].astype(f32)).reshape(1, -1),
    }


# --------------------------------- wrapper -------------------------------------
def gqa_transformer_encoder_layer(x, params, *, nhead, kv_heads, is_causal=False,
                                  compute_dtype=jnp.bfloat16,
                                  seq_tile=512, kv_seq_tile=512, ff_tile=512):
    if "wqkv" not in params:                     # accept raw params too
        params = prepare_params(params, compute_dtype)
    cd = params["compute_dtype"]
    f32 = jnp.float32
    approx = (cd != jnp.float32)

    B, N, D = x.shape
    head_dim = D // nhead
    groups = nhead // kv_heads
    kv_dim = params["kv_dim"]
    ff_dim = params["ff_dim"]

    tq = _pick_tile(N, seq_tile)
    tk = _pick_tile(N, kv_seq_tile)
    tf = _pick_tile(ff_dim, ff_tile)
    n_sq = N // tq
    n_kv = N // tk
    n_ff = ff_dim // tf
    vmem = _vmem_limit_bytes()

    rep2 = lambda p: pl.BlockSpec(p.shape, lambda b, i: (0, 0))
    rep3 = lambda p: pl.BlockSpec(p.shape, lambda b, i, j: (0, 0))

    # ---- 1. norm1 + fused QKV projection -------------------------------------
    q, k, v = pl.pallas_call(
        functools.partial(_qkv_kernel, d_model=D, kv_dim=kv_dim, compute_dtype=cd),
        out_shape=(jax.ShapeDtypeStruct((B, N, D), cd),
                   jax.ShapeDtypeStruct((B, N, kv_dim), cd),
                   jax.ShapeDtypeStruct((B, N, kv_dim), cd)),
        grid_spec=pltpu.PrefetchScalarGridSpec(
            num_scalar_prefetch=0, grid=(B, n_sq),
            in_specs=[pl.BlockSpec((None, tq, D), lambda b, i: (b, i, 0)),
                      rep2(params["n1g"]), rep2(params["n1b"]),
                      rep2(params["wqkv"]), rep2(params["bqkv"])],
            out_specs=(pl.BlockSpec((None, tq, D), lambda b, i: (b, i, 0)),
                       pl.BlockSpec((None, tq, kv_dim), lambda b, i: (b, i, 0)),
                       pl.BlockSpec((None, tq, kv_dim), lambda b, i: (b, i, 0)))),
        compiler_params=pltpu.CompilerParams(
            dimension_semantics=("parallel", "parallel"),
            vmem_limit_bytes=vmem),
    )(x, params["n1g"], params["n1b"], params["wqkv"], params["bqkv"])

    # ---- 2. grouped flash attention (no wrapper transposes) -------------------
    scale = 1.0 / (head_dim ** 0.5)
    if is_causal:
        def kv_map(b, i, j):
            # clamp: fully-future kv tiles revisit the previous block and their
            # DMA is skipped (compute for them is skipped in the kernel).
            last = ((i + 1) * tq - 1) // tk
            return (b, jnp.minimum(j, last), 0)
    else:
        def kv_map(b, i, j):
            return (b, j, 0)

    attn = pl.pallas_call(
        functools.partial(_flash_kernel, scale=scale, nhead=nhead, groups=groups,
                          head_dim=head_dim, q_tile=tq, kv_tile=tk,
                          is_causal=is_causal, approx_recip=approx),
        out_shape=jax.ShapeDtypeStruct((B, N, D), cd),
        grid_spec=pltpu.PrefetchScalarGridSpec(
            num_scalar_prefetch=0, grid=(B, n_sq, n_kv),
            in_specs=[pl.BlockSpec((None, tq, D), lambda b, i, j: (b, i, 0)),
                      pl.BlockSpec((None, tk, kv_dim), kv_map),
                      pl.BlockSpec((None, tk, kv_dim), kv_map)],
            out_specs=pl.BlockSpec((None, tq, D), lambda b, i, j: (b, i, 0)),
            scratch_shapes=[pltpu.VMEM((tq, nhead), f32),           # running max
                            pltpu.VMEM((tq, nhead), f32),           # running denom
                            pltpu.VMEM((nhead, tq, head_dim), f32)  # PV accumulator
                            ]),
        compiler_params=pltpu.CompilerParams(
            dimension_semantics=("parallel", "parallel", "arbitrary"),
            vmem_limit_bytes=vmem),
    )(q, k, v)

    # ---- 3. attn LayerNorm + out_proj + residual fused with the FFN ----------
    out = pl.pallas_call(
        functools.partial(_out_ffn_kernel, ff_dim=float(ff_dim), compute_dtype=cd),
        out_shape=jax.ShapeDtypeStruct((B, N, D), x.dtype),
        grid_spec=pltpu.PrefetchScalarGridSpec(
            num_scalar_prefetch=0, grid=(B, n_sq, n_ff),
            in_specs=[pl.BlockSpec((None, tq, D), lambda b, i, j: (b, i, 0)),
                      pl.BlockSpec((None, tq, D), lambda b, i, j: (b, i, 0)),
                      rep3(params["ang"]), rep3(params["anb"]),
                      rep3(params["wo"]), rep3(params["bo"]),
                      rep3(params["n2g"]), rep3(params["n2b"]),
                      pl.BlockSpec((D, tf), lambda b, i, j: (0, j)),   # w1 tile
                      pl.BlockSpec((1, tf), lambda b, i, j: (0, j)),   # b1 tile
                      pl.BlockSpec((1, tf), lambda b, i, j: (0, j)),   # norm3 gamma
                      pl.BlockSpec((tf, D), lambda b, i, j: (j, 0)),   # w2 tile
                      rep3(params["gw2"]), rep3(params["bw2"])],
            out_specs=pl.BlockSpec((None, tq, D), lambda b, i, j: (b, i, 0)),
            scratch_shapes=[pltpu.VMEM((tq, D), f32),    # x1 (post-attn residual)
                            pltpu.VMEM((tq, D), cd),     # ln2(x1)
                            pltpu.VMEM((tq, 1), f32),    # sum(h)
                            pltpu.VMEM((tq, 1), f32),    # sum(h^2)
                            pltpu.VMEM((tq, D), f32)]),  # (h*g3)@w2 accumulator
        compiler_params=pltpu.CompilerParams(
            dimension_semantics=("parallel", "parallel", "arbitrary"),
            vmem_limit_bytes=vmem),
    )(x, attn, params["ang"], params["anb"], params["wo"], params["bo"],
      params["n2g"], params["n2b"], params["w1"], params["b1"], params["n3g"],
      params["w2"], params["gw2"], params["bw2"])
    return out


# ---------------- pure-JAX reference (same math, no Pallas) ----------------
def _reference_forward(x, params, *, nhead, kv_heads, is_causal=False):
    B, N, D = x.shape
    head_dim = D // nhead
    groups = nhead // kv_heads
    scale = 1.0 / (head_dim ** 0.5)

    def ln(v, g, b):
        m = jnp.mean(v, axis=-1, keepdims=True)
        var = jnp.mean(jnp.square(v - m), axis=-1, keepdims=True)
        return (v - m) / jnp.sqrt(var + LN_EPS) * g + b

    h = ln(x, params["n1g"], params["n1b"])
    q = h @ params["wq"] + params["bq"]
    k = h @ params["wk"] + params["bk"]
    v = h @ params["wv"] + params["bv"]
    outs = []
    for qh in range(nhead):
        kvh = qh // groups
        qs = q[..., qh * head_dim:(qh + 1) * head_dim]
        ks = k[..., kvh * head_dim:(kvh + 1) * head_dim]
        vs = v[..., kvh * head_dim:(kvh + 1) * head_dim]
        s = jnp.einsum("bnd,bsd->bns", qs, ks) * scale
        if is_causal:
            mask = jnp.tril(jnp.ones((N, N), dtype=bool))
            s = jnp.where(mask, s, jnp.finfo(jnp.float32).min)
        p = jax.nn.softmax(s, axis=-1)
        outs.append(jnp.einsum("bns,bsd->bnd", p, vs))
    attn = jnp.concatenate(outs, axis=-1)
    attn = ln(attn, params["ang"], params["anb"])
    attn = attn @ params["wo"] + params["bo"]
    x = x + attn
    h = ln(x, params["n2g"], params["n2b"])
    h = jnp.maximum(h @ params["w1"] + params["b1"], 0.0)
    h = ln(h, params["n3g"], params["n3b"])
    h = h @ params["w2"] + params["b2"]
    return x + h


def init_params(key, d_model, nhead, kv_heads, dim_feedforward, gamma_init=1.0):
    head_dim = d_model // nhead
    kv_dim = head_dim * kv_heads
    ks = jax.random.split(key, 6)

    def xavier(k, fan_in, fan_out, gain=1.0):
        std = gain * (2.0 / (fan_in + fan_out)) ** 0.5
        return std * jax.random.normal(k, (fan_in, fan_out), dtype=jnp.float32)

    f32 = jnp.float32
    return {
        # norm1
        "n1g": jnp.ones((1, d_model), f32), "n1b": jnp.zeros((1, d_model), f32),
        # MultiheadGQA projections
        "wq": xavier(ks[0], d_model, d_model), "bq": jnp.zeros((1, d_model), f32),
        "wk": xavier(ks[1], d_model, kv_dim), "bk": jnp.zeros((1, kv_dim), f32),
        "wv": xavier(ks[2], d_model, kv_dim), "bv": jnp.zeros((1, kv_dim), f32),
        # MultiheadGQA internal layer norm + out_proj
        "ang": jnp.ones((1, d_model), f32), "anb": jnp.zeros((1, d_model), f32),
        "wo": xavier(ks[3], d_model, d_model, gamma_init), "bo": jnp.zeros((1, d_model), f32),
        # norm2 / FFN / norm3
        "n2g": jnp.ones((1, d_model), f32), "n2b": jnp.zeros((1, d_model), f32),
        "w1": xavier(ks[4], d_model, dim_feedforward, gamma_init),
        "b1": jnp.zeros((1, dim_feedforward), f32),
        "n3g": jnp.ones((1, dim_feedforward), f32),
        "n3b": jnp.zeros((1, dim_feedforward), f32),
        "w2": xavier(ks[5], dim_feedforward, d_model, gamma_init),
        "b2": jnp.zeros((1, d_model), f32),
    }


if __name__ == "__main__":
    key = jax.random.PRNGKey(0)
    B, N, D = 2, 8, 32
    NHEAD, KV_HEADS, DIM_FF = 4, 2, 64

    kx, kp = jax.random.split(key)
    x = jax.random.normal(kx, (B, N, D), dtype=jnp.float32)
    params = init_params(kp, D, NHEAD, KV_HEADS, DIM_FF)

    ref = _reference_forward(x, params, nhead=NHEAD, kv_heads=KV_HEADS, is_causal=False)
    ref_c = _reference_forward(x, params, nhead=NHEAD, kv_heads=KV_HEADS, is_causal=True)

    # weight prep hoisted out of the forward path (done once per dtype)
    prep_f32 = prepare_params(params, jnp.float32)
    prep_bf16 = prepare_params(params, jnp.bfloat16)

    # exact-precision path (compute_dtype=f32) must match the reference tightly
    out_f32 = jax.block_until_ready(
        gqa_transformer_encoder_layer(x, prep_f32, nhead=NHEAD, kv_heads=KV_HEADS,
                                      is_causal=False))
    assert out_f32.shape == (B, N, D)
    err = float(jnp.max(jnp.abs(out_f32 - ref)))
    assert err < 1e-4, f"f32 mismatch vs reference: {err}"

    out_f32_c = jax.block_until_ready(
        gqa_transformer_encoder_layer(x, prep_f32, nhead=NHEAD, kv_heads=KV_HEADS,
                                      is_causal=True))
    err_c = float(jnp.max(jnp.abs(out_f32_c - ref_c)))
    assert err_c < 1e-4, f"causal f32 mismatch vs reference: {err_c}"

    # default fast path: bf16 matmul operands / bf16 attention output,
    # f32 accumulation, LayerNorm statistics and softmax in f32
    out_bf16 = jax.block_until_ready(
        gqa_transformer_encoder_layer(x, prep_bf16, nhead=NHEAD, kv_heads=KV_HEADS,
                                      is_causal=False))
    err_b = float(jnp.max(jnp.abs(out_bf16 - ref)))
    tol_b = 5e-2 * (1.0 + float(jnp.max(jnp.abs(ref))))
    assert err_b < tol_b, f"bf16 mismatch vs reference: {err_b} (tol {tol_b})"

    print("KERNEL_OK")
</pallas_src>

<mosaic_0001>
module attributes {stable_mosaic.version = 11 : i64} {
  func.func @_qkv_kernel(%arg0: i32, %arg1: i32, %arg2: memref<1x8x32xf32, #tpu.memory_space<vmem>>, %arg3: memref<1x32xf32, #tpu.memory_space<vmem>>, %arg4: memref<1x32xf32, #tpu.memory_space<vmem>>, %arg5: memref<32x64xf32, #tpu.memory_space<vmem>>, %arg6: memref<1x64xf32, #tpu.memory_space<vmem>>, %arg7: memref<1x8x32xf32, #tpu.memory_space<vmem>>, %arg8: memref<1x8x16xf32, #tpu.memory_space<vmem>>, %arg9: memref<1x8x16xf32, #tpu.memory_space<vmem>>) attributes {dimension_semantics = [#tpu.dimension_semantics<parallel>, #tpu.dimension_semantics<parallel>], iteration_bounds = array<i64: 2, 1>, scalar_prefetch = 0 : i64, scratch_operands = 0 : i64, tpu.core_type = #tpu.core_type<tc>, window_params = [{transform_indices = @transform_0, window_bounds = array<i64: 1, 8, 32>}, {pipeline_mode = #tpu.pipeline_mode<synchronous>, transform_indices = @transform_1, window_bounds = array<i64: 1, 32>}, {pipeline_mode = #tpu.pipeline_mode<synchronous>, transform_indices = @transform_2, window_bounds = array<i64: 1, 32>}, {pipeline_mode = #tpu.pipeline_mode<synchronous>, transform_indices = @transform_3, window_bounds = array<i64: 32, 64>}, {pipeline_mode = #tpu.pipeline_mode<synchronous>, transform_indices = @transform_4, window_bounds = array<i64: 1, 64>}, {transform_indices = @transform_5, window_bounds = array<i64: 1, 8, 32>}, {transform_indices = @transform_6, window_bounds = array<i64: 1, 8, 16>}, {transform_indices = @transform_7, window_bounds = array<i64: 1, 8, 16>}]} {
    %c0 = arith.constant 0 : index
    %c0_0 = arith.constant 0 : index
    %c0_1 = arith.constant 0 : index
    %0 = vector.load %arg2[%c0, %c0_0, %c0_1] : memref<1x8x32xf32, #tpu.memory_space<vmem>>, vector<1x8x32xf32>
    %1 = vector.shape_cast %0 : vector<1x8x32xf32> to vector<8x32xf32>
    %c0_2 = arith.constant 0 : index
    %c0_3 = arith.constant 0 : index
    %2 = vector.load %arg3[%c0_2, %c0_3] : memref<1x32xf32, #tpu.memory_space<vmem>>, vector<1x32xf32>
    %c0_4 = arith.constant 0 : index
    %c0_5 = arith.constant 0 : index
    %3 = vector.load %arg4[%c0_4, %c0_5] : memref<1x32xf32, #tpu.memory_space<vmem>>, vector<1x32xf32>
    %cst = arith.constant dense<0.000000e+00> : vector<8xf32>
    %4 = vector.multi_reduction <add>, %1, %cst [1] : vector<8x32xf32> to vector<8xf32>
    %5 = vector.shape_cast %4 : vector<8xf32> to vector<8x1xf32>
    %cst_6 = arith.constant 3.200000e+01 : f32
    %6 = vector.broadcast %cst_6 : f32 to vector<8x1xf32>
    %7 = arith.divf %5, %6 : vector<8x1xf32>
    %8 = vector.broadcast %7 : vector<8x1xf32> to vector<8x32xf32>
    %9 = arith.subf %1, %8 : vector<8x32xf32>
    %10 = arith.mulf %9, %9 : vector<8x32xf32>
    %cst_7 = arith.constant dense<0.000000e+00> : vector<8xf32>
    %11 = vector.multi_reduction <add>, %10, %cst_7 [1] : vector<8x32xf32> to vector<8xf32>
    %12 = vector.shape_cast %11 : vector<8xf32> to vector<8x1xf32>
    %cst_8 = arith.constant 3.200000e+01 : f32
    %13 = vector.broadcast %cst_8 : f32 to vector<8x1xf32>
    %14 = arith.divf %12, %13 : vector<8x1xf32>
    %15 = vector.broadcast %7 : vector<8x1xf32> to vector<8x32xf32>
    %16 = arith.subf %1, %15 : vector<8x32xf32>
    %cst_9 = arith.constant 9.99999974E-6 : f32
    %17 = vector.broadcast %cst_9 : f32 to vector<8x1xf32>
    %18 = arith.addf %14, %17 : vector<8x1xf32>
    %19 = math.rsqrt %18 : vector<8x1xf32>
    %20 = vector.broadcast %19 : vector<8x1xf32> to vector<8x32xf32>
    %21 = arith.mulf %16, %20 : vector<8x32xf32>
    %22 = vector.broadcast %2 : vector<1x32xf32> to vector<8x32xf32>
    %23 = arith.mulf %21, %22 : vector<8x32xf32>
    %24 = vector.broadcast %3 : vector<1x32xf32> to vector<8x32xf32>
    %25 = arith.addf %23, %24 : vector<8x32xf32>
    %c0_10 = arith.constant 0 : index
    %c0_11 = arith.constant 0 : index
    %26 = vector.load %arg5[%c0_10, %c0_11] : memref<32x64xf32, #tpu.memory_space<vmem>>, vector<32x64xf32>
    %cst_12 = arith.constant dense<0.000000e+00> : vector<8x64xf32>
    %27 = tpu.matmul %25, %26, %cst_12 {dimension_numbers = #tpu.dot_dimension_numbers<[1], [0], [0], [1], [0, 0, 1, 1], [], []>} : vector<8x32xf32>, vector<32x64xf32>, vector<8x64xf32> -> vector<8x64xf32>
    %c0_13 = arith.constant 0 : index
    %c0_14 = arith.constant 0 : index
    %28 = vector.load %arg6[%c0_13, %c0_14] : memref<1x64xf32, #tpu.memory_space<vmem>>, vector<1x64xf32>
    %29 = vector.broadcast %28 : vector<1x64xf32> to vector<8x64xf32>
    %30 = arith.addf %27, %29 : vector<8x64xf32>
    %31 = vector.extract_strided_slice %30 {offsets = [0, 0], sizes = [8, 32], strides = [1, 1]} : vector<8x64xf32> to vector<8x32xf32>
    %c0_15 = arith.constant 0 : index
    %c0_16 = arith.constant 0 : index
    %c0_17 = arith.constant 0 : index
    %32 = vector.load %arg7[%c0_15, %c0_16, %c0_17] : memref<1x8x32xf32, #tpu.memory_space<vmem>>, vector<1x8x32xf32>
    %33 = vector.shape_cast %32 : vector<1x8x32xf32> to vector<8x32xf32>
    %34 = vector.shape_cast %31 : vector<8x32xf32> to vector<1x8x32xf32>
    tpu.vector_store %arg7[%c0_15, %c0_16, %c0_17], %34 {strides = array<i32>} : memref<1x8x32xf32, #tpu.memory_space<vmem>>, vector<1x8x32xf32>,
    %35 = vector.extract_strided_slice %30 {offsets = [0, 32], sizes = [8, 16], strides = [1, 1]} : vector<8x64xf32> to vector<8x16xf32>
    %c0_18 = arith.constant 0 : index
    %c0_19 = arith.constant 0 : index
    %c0_20 = arith.constant 0 : index
    %36 = vector.load %arg8[%c0_18, %c0_19, %c0_20] : memref<1x8x16xf32, #tpu.memory_space<vmem>>, vector<1x8x16xf32>
    %37 = vector.shape_cast %36 : vector<1x8x16xf32> to vector<8x16xf32>
    %38 = vector.shape_cast %35 : vector<8x16xf32> to vector<1x8x16xf32>
    tpu.vector_store %arg8[%c0_18, %c0_19, %c0_20], %38 {strides = array<i32>} : memref<1x8x16xf32, #tpu.memory_space<vmem>>, vector<1x8x16xf32>,
    %39 = vector.extract_strided_slice %30 {offsets = [0, 48], sizes = [8, 16], strides = [1, 1]} : vector<8x64xf32> to vector<8x16xf32>
    %c0_21 = arith.constant 0 : index
    %c0_22 = arith.constant 0 : index
    %c0_23 = arith.constant 0 : index
    %40 = vector.load %arg9[%c0_21, %c0_22, %c0_23] : memref<1x8x16xf32, #tpu.memory_space<vmem>>, vector<1x8x16xf32>
    %41 = vector.shape_cast %40 : vector<1x8x16xf32> to vector<8x16xf32>
    %42 = vector.shape_cast %39 : vector<8x16xf32> to vector<1x8x16xf32>
    tpu.vector_store %arg9[%c0_21, %c0_22, %c0_23], %42 {strides = array<i32>} : memref<1x8x16xf32, #tpu.memory_space<vmem>>, vector<1x8x16xf32>,
    return
  }
  func.func @transform_0(%arg0: i32, %arg1: i32) -> (i32, i32, i32) {
    %c0_i32 = arith.constant 0 : i32
    %c0_i32_0 = arith.constant 0 : i32
    return %arg0, %arg1, %c0_i32 : i32, i32, i32
  }
  func.func @transform_1(%arg0: i32, %arg1: i32) -> (i32, i32) {
    %c0_i32 = arith.constant 0 : i32
    %c0_i32_0 = arith.constant 0 : i32
    %c0_i32_1 = arith.constant 0 : i32
    return %c0_i32, %c0_i32_0 : i32, i32
  }
  func.func @transform_2(%arg0: i32, %arg1: i32) -> (i32, i32) {
    %c0_i32 = arith.constant 0 : i32
    %c0_i32_0 = arith.constant 0 : i32
    %c0_i32_1 = arith.constant 0 : i32
    return %c0_i32, %c0_i32_0 : i32, i32
  }
  func.func @transform_3(%arg0: i32, %arg1: i32) -> (i32, i32) {
    %c0_i32 = arith.constant 0 : i32
    %c0_i32_0 = arith.constant 0 : i32
    %c0_i32_1 = arith.constant 0 : i32
    return %c0_i32, %c0_i32_0 : i32, i32
  }
  func.func @transform_4(%arg0: i32, %arg1: i32) -> (i32, i32) {
    %c0_i32 = arith.constant 0 : i32
    %c0_i32_0 = arith.constant 0 : i32
    %c0_i32_1 = arith.constant 0 : i32
    return %c0_i32, %c0_i32_0 : i32, i32
  }
  func.func @transform_5(%arg0: i32, %arg1: i32) -> (i32, i32, i32) {
    %c0_i32 = arith.constant 0 : i32
    %c0_i32_0 = arith.constant 0 : i32
    return %arg0, %arg1, %c0_i32 : i32, i32, i32
  }
  func.func @transform_6(%arg0: i32, %arg1: i32) -> (i32, i32, i32) {
    %c0_i32 = arith.constant 0 : i32
    %c0_i32_0 = arith.constant 0 : i32
    return %arg0, %arg1, %c0_i32 : i32, i32, i32
  }
  func.func @transform_7(%arg0: i32, %arg1: i32) -> (i32, i32, i32) {
    %c0_i32 = arith.constant 0 : i32
    %c0_i32_0 = arith.constant 0 : i32
    return %arg0, %arg1, %c0_i32 : i32, i32, i32
  }
}

</mosaic_0001>

<bundles_post_ra>
// kernel: tpu_custom_call.1
= control target key start
LH: loop header
LB: loop body
LE: loop exit
PB: predicated region body
PF: predicated region fallthrough
CT: control target
= control target key end

     0   :  { %s1643_s0 = inlined_call_operand.hbm [shape: f32[2,8,32], index: 0, kind: input, shape index: {}]   ;;  %s1644_s1 = inlined_call_operand.hbm [shape: f32[1,32], index: 1, kind: input, shape index: {}]   ;;  %s1645_s2 = inlined_call_operand.hbm [shape: f32[1,32], index: 2, kind: input, shape index: {}]   ;;  %s1646_s3 = inlined_call_operand.hbm [shape: f32[32,64], index: 3, kind: input, shape index: {}]   ;;  %s1647_s4 = inlined_call_operand.hbm [shape: f32[1,64], index: 4, kind: input, shape index: {}]   ;;  %s1648_s5 = inlined_call_operand.hbm [shape: f32[2,8,32], index: 5, kind: output, shape index: {0}]   ;;  %s1649_s6 = inlined_call_operand.hbm [shape: f32[2,8,16], index: 6, kind: output, shape index: {1}]   ;;  %s1650_s7 = inlined_call_operand.hbm [shape: f32[2,8,16], index: 7, kind: output, shape index: {2}]  }
   0x1   :  { %1655 = sst [smem:[#allocation20_spill]] %s1644_s1 }
   0x2   :  { %1656 = sst [smem:[#allocation21_spill]] %s1645_s2 }
   0x3   :  { %13 = vsyncpa [#allocation3], 0 }
   0x4   :  { %15 = vsyncpa [#allocation3 + $0x1], 0 }
   0x5   :  { %16 = vsyncpa [#allocation6], 0 }
   0x6   :  { %17 = vsyncpa [#allocation9], 0 }
   0x7   :  { %18 = vsyncpa [#allocation4], 0 }
   0x8   :  { %20 = vsyncpa [#allocation4 + $0x1], 0 }
   0x9   :  { %21 = vsyncpa [#allocation13], 0 }
   0xa   :  { %23 = vsyncpa [#allocation13 + $0x1], 0  ;;  %s1270_s24 = smov 0   ;;  %s1272_s25 = smov 0  }
   0xb   :  { %s1274_s26 = smov 0   ;;  %s1276_s27 = smov 0  }
   0xc   :  { %s1278_s28 = smov 0   ;;  %s1280_s29 = smov 0  }
   0xd LB: > { %s1301_s30 = sadd.s32 4294967295, %s1213_s29   ;;  %p748_p0 = scmp.ge.s32.totalorder %s1213_s29, 1  ;;  %s1213_s29 = sphi %s1280_s29, %s29_s29   ;;  %s1209_s28 = sphi %s1278_s28, %s1681_s28   ;;  %s1205_s27 = sphi %s1276_s27, %s1680_s27   ;;  %s1201_s26 = sphi %s1274_s26, %s1679_s26   ;;  %s1197_s25 = sphi %s1272_s25, %s1678_s25   ;;  %s1193_s24 = sphi %s1270_s24, %s1677_s24  }
   0xe   : > { %p1651_p1 = scmp.eq.s32.totalorder %s1301_s30, 0  ;;  %p242_p2 = scmp.lt.s32.totalorder %s1213_s29, 3 }
   0xf   : > { %s1215_s9 = smov [#allocation5]   ;;  %s1216_s11 = smov [#allocation8]  }
  0x10   : > { %p1306_p3 = pnand %p748_p0, %p242_p2  ;;  %s255_s10 = sshll.u32 %s1215_s9, 4  ;;  %s256_s10 = int_to_ptr.vmem [resolvable:$true] %s255_s10 }
  0x11   : > { %s276_s12 = sshll.u32 %s1216_s11, 4  ;;  %s1217_s14 = smov [#allocation7]   ;;  %s1319_s12 = int_to_ptr.vmem [resolvable:$true] %s276_s12 }
  0x12   : > { %s1657_s8 = scalar_select %p1306_p3, 1, 0 }
  0x13   : > { %p823_p5 = pneg %p1306_p3  ;;  %s1321_s15 = sshll.u32 %s1217_s14, 4  ;;  %s267_s15 = int_to_ptr.vmem [resolvable:$true] %s1321_s15 }
  0x14   : > { %s1659_s1 = sld [smem:[#allocation20_spill]] }
  0x15   : > { %p1315_p6 = pnand %p823_p5, %p1651_p1 }
  0x17   : > { %p1331_p8 = pneg %p1315_p6 }
  0x1a   : > { %s921_s18 = scalar_lea.hbm %s1659_s1, 16 }
  0x1b   : > { %p922_p7 = scmp.ne.s32.totalorder %s1659_s1, %s921_s18  ;;  %p928_p11 = scmp.lt.u32.totalorder %s921_s18, %s1659_s1 }
  0x1d   : > { %p924_p9 = pnand %p1331_p8, %p922_p7 }
  0x1f   : > { %p925_p10 = pneg %p924_p9 }
  0x21   : > { %p930_p12 = pnand %p928_p11, %p925_p10 }
  0x23   : > { %933 = shalt.err (!%p930_p12)
}
  0x24   : > { %s934_s9 = scalar_lea.vmem %s256_s10, 16  ;;  %s941_s11 = scalar_lea.vmem %s256_s10, 32 }
  0x25   : > { %p935_p13 = scmp.ne.s32.totalorder %s256_s10, %s934_s9  ;;  %p942_p5 = scmp.lt.s32.totalorder %s256_s10, %s256_s10 }
  0x26   : > { %p943_p4 = scmp.lt.s32.totalorder %s941_s11, %s934_s9 }
  0x27   : > { %p937_p0 = pnand %p935_p13, %p1331_p8 }
  0x28   : > { %p944_p1 = por %p943_p4, %p942_p5 }
  0x29   : > { %p938_p2 = pneg %p937_p0 }
  0x2b   : > { %p945_p3 = pnand %p944_p1, %p938_p2 }
  0x2d   : > { %948 = shalt.err (!%p945_p3)
}
  0x2e   : > { %826 = dma.hbm_to_vmem [thread:$0]  (!%p1315_p6), %s1659_s1, 16, %s256_s10, [#allocation6]  }
  0x2f   : > { %s949_s19 = scalar_lea.hbm %s1646_s3, 512 }
  0x30   : > { %p950_p7 = scmp.ne.s32.totalorder %s1646_s3, %s949_s19  ;;  %p956_p1 = scmp.lt.u32.totalorder %s949_s19, %s1646_s3 }
  0x32   : > { %p952_p9 = pnand %p950_p7, %p1331_p8 }
  0x34   : > { %p953_p4 = pneg %p952_p9 }
  0x36   : > { %p958_p3 = pnand %p956_p1, %p953_p4 }
  0x38   : > { %961 = shalt.err (!%p958_p3)
}
  0x39   : > { %s962_s10 = scalar_lea.vmem %s1319_s12, 512  ;;  %p970_p13 = scmp.lt.s32.totalorder %s1319_s12, %s1319_s12 }
  0x3a   : > { %p963_p10 = scmp.ne.s32.totalorder %s1319_s12, %s962_s10  ;;  %p971_p0 = scmp.lt.s32.totalorder %s962_s10, %s962_s10 }
  0x3c   : > { %p965_p11 = pnand %p963_p10, %p1331_p8  ;;  %p972_p2 = por %p971_p0, %p970_p13 }
  0x3e   : > { %p966_p12 = pneg %p965_p11 }
  0x40   : > { %p973_p5 = pnand %p972_p2, %p966_p12 }
  0x42   : > { %976 = shalt.err (!%p973_p5)
}
  0x43   : > { %s1218_s11 = smov 128   ;;  %s1219_s14 = smov 8  }
  0x44   : > { %832 = dma.hbm_to_vmem [thread:$0]  (!%p1315_p6), %s1646_s3, 512, %s1319_s12, [#allocation9], %s1218_s11, %s1218_s11, %s1219_s14  }
  0x45   : > { %s1661_s2 = sld [smem:[#allocation21_spill]] }
  0x4b   : > { %s977_s20 = scalar_lea.hbm %s1661_s2, 16 }
  0x4c   : > { %p978_p7 = scmp.ne.s32.totalorder %s1661_s2, %s977_s20  ;;  %p984_p1 = scmp.lt.u32.totalorder %s977_s20, %s1661_s2 }
  0x4e   : > { %p980_p9 = pnand %p978_p7, %p1331_p8 }
  0x50   : > { %p981_p4 = pneg %p980_p9 }
  0x52   : > { %p986_p3 = pnand %p984_p1, %p981_p4 }
  0x54   : > { %989 = shalt.err (!%p986_p3)
}
  0x55   : > { %s990_s16 = scalar_lea.vmem %s267_s15, 16  ;;  %s997_s12 = scalar_lea.vmem %s267_s15, 32 }
  0x56   : > { %p991_p10 = scmp.ne.s32.totalorder %s267_s15, %s990_s16  ;;  %p998_p13 = scmp.lt.s32.totalorder %s267_s15, %s267_s15 }
  0x57   : > { %p999_p0 = scmp.lt.s32.totalorder %s997_s12, %s990_s16 }
  0x58   : > { %p993_p11 = pnand %p991_p10, %p1331_p8 }
  0x59   : > { %p1000_p2 = por %p999_p0, %p998_p13 }
  0x5a   : > { %p994_p12 = pneg %p993_p11 }
  0x5c   : > { %p1001_p5 = pnand %p1000_p2, %p994_p12 }
  0x5e   : > { %1004 = shalt.err (!%p1001_p5)
}
  0x5f   : > { %829 = dma.hbm_to_vmem [thread:$0]  (!%p1315_p6), %s1661_s2, 16, %s267_s15, [#allocation6]  }
  0x60   : > { %s1220_s17 = smov [#allocation10]   ;;  %s1005_s22 = scalar_lea.hbm %s1647_s4, 16 }
  0x61   : > { %s290_s18 = sshll.u32 %s1220_s17, 4  ;;  %p1006_p7 = scmp.ne.s32.totalorder %s1647_s4, %s1005_s22  ;;  %s291_s18 = int_to_ptr.vmem [resolvable:$true] %s290_s18 }
  0x62   : > { %p1012_p1 = scmp.lt.u32.totalorder %s1005_s22, %s1647_s4 }
  0x63   : > { %p1008_p9 = pnand %p1006_p7, %p1331_p8 }
  0x65   : > { %p1009_p4 = pneg %p1008_p9 }
  0x67   : > { %p1014_p3 = pnand %p1012_p1, %p1009_p4 }
  0x69   : > { %1017 = shalt.err (!%p1014_p3)
}
  0x6a   : > { %s1018_s15 = scalar_lea.vmem %s291_s18, 16  ;;  %s1025_s12 = scalar_lea.vmem %s291_s18, 32 }
  0x6b   : > { %p1019_p10 = scmp.ne.s32.totalorder %s291_s18, %s1018_s15  ;;  %p1026_p13 = scmp.lt.s32.totalorder %s291_s18, %s291_s18 }
  0x6c   : > { %p1027_p0 = scmp.lt.s32.totalorder %s1025_s12, %s1018_s15 }
  0x6d   : > { %p1021_p11 = pnand %p1019_p10, %p1331_p8 }
  0x6e   : > { %p1028_p2 = por %p1027_p0, %p1026_p13 }
  0x6f   : > { %p1022_p12 = pneg %p1021_p11 }
  0x71   : > { %p1029_p5 = pnand %p1028_p2, %p1022_p12 }
  0x73   : > { %1032 = shalt.err (!%p1029_p5)
}
  0x74   : > { %835 = dma.hbm_to_vmem [thread:$0]  (!%p1315_p6), %s1647_s4, 16, %s291_s18, [#allocation9]  }
  0x75   : > { %s1653_s21 = sadd.s32 4294967294, %s1213_s29   ;;  %s41_s17 = sadd.s32 1, %s1209_s28 }
  0x76   : > { %p43_p8 = scmp.ge.s32.totalorder %s41_s17, 2  ;;  %s50_s13 = sadd.s32 1, %s1201_s26 }
  0x77   : > { %p57_p7 = scmp.ne.s32.totalorder %s1201_s26, %s1197_s25  ;;  %p58_p9 = scmp.eq.s32.totalorder %s1213_s29, 0 }
  0x78   : > { %s1683_s17 = smov (%p43_p8, %s41_s17), 0  ;;  %p63_p1 = scmp.ne.s32.totalorder %s1197_s25, %s1193_s24 }
  0x79   : > { %p1415_p4 = por %p58_p9, %p57_p7  ;;  %s45_s18 = ssub.s32 %s1209_s28, %s1683_s17 }
  0x7a   : > { %p173_p6 = scmp.eq.s32.totalorder %s1301_s30, 1  ;;  %p48_p3 = scmp.eq.s32.totalorder %s45_s18, 0 }
  0x7b   : > { %p1663_p10 = scmp.eq.s32.totalorder %s1301_s30, 0  ;;  %p179_p13 = scmp.eq.s32.totalorder %s1653_s21, 1 }
  0x7c   : > { %p1430_p12 = por %p173_p6, %p57_p7  ;;  %p854_p2 = scmp.lt.s32.totalorder %s1213_s29, 2 }
  0x7d   : > { %p1426_p11 = por %p1663_p10, %p63_p1  ;;  %p1439_p0 = por %p179_p13, %p63_p1 }
  0x7e   : > { %s1665_s22 = scalar_select %p1430_p12, 1, 0 }
  0x7f   : > { %s1437_s23 = scalar_select %p48_p3, %s1201_s26, %s50_s13  }
  0x80   : > { %s1666_s9 = scalar_select %p1439_p0, 1, 0 }
  0x81   : > { %s301_s10 = sand.u32 1, %s1201_s26   ;;  %s755_s16 = sshll.u32 %s1209_s28, 7 }
  0x82   : > { %s754_s15 = sshll.u32 %s301_s10, 3  ;;  %s1449_s14 = scalar_lea.hbm %s1643_s0, %s755_s16 }
  0x83   : > { %s305_s18 = scalar_lea.vmem [#allocation2], %s754_s15  ;;  %p1453_p5 = pnand %p854_p2, %p1415_p4 }
  0x84   : > { %s313_s13 = sshll.u32 %s305_s18, 4  ;;  %s302_s1 = scalar_lea.sflag [#allocation3], %s301_s10  ;;  %s1457_s13 = int_to_ptr.vmem [resolvable:$true] %s313_s13 }
  0x85   : > { %s1033_s2 = scalar_lea.hbm %s1449_s14, 128  ;;  %p1035_p7 = pneg %p1453_p5 }
  0x86   : > { %p1034_p8 = scmp.ne.s32.totalorder %s1449_s14, %s1033_s2  ;;  %s1038_s19 = scalar_lea.hbm %s1643_s0, 256 }
  0x87   : > { %p1039_p4 = scmp.lt.u32.totalorder %s1449_s14, %s1643_s0  ;;  %p1040_p6 = scmp.lt.u32.totalorder %s1038_s19, %s1033_s2 }
  0x88   : > { %p1036_p9 = pnand %p1035_p7, %p1034_p8  ;;  %p1042_p10 = scmp.lt.u32.totalorder %s1033_s2, %s1449_s14 }
  0x89   : > { %p1041_p3 = por %p1040_p6, %p1039_p4 }
  0x8a   : > { %p1037_p1 = pneg %p1036_p9 }
  0x8b   : > { %p1043_p13 = por %p1042_p10, %p1041_p3 }
  0x8d   : > { %p1044_p2 = pnand %p1043_p13, %p1037_p1 }
  0x8f   : > { %1047 = shalt.err (!%p1044_p2)
}
  0x90   : > { %s1048_s10 = scalar_lea.vmem %s1457_s13, 128  ;;  %s1221_s18 = smov [#allocation2]  }
  0x91   : > { %p1049_p8 = scmp.ne.s32.totalorder %s1457_s13, %s1048_s10  ;;  %s1053_s16 = sshll.u32 %s1221_s18, 4  ;;  %s1054_s16 = int_to_ptr.vmem [resolvable:$false] %s1053_s16 }
  0x92   : > { %s1055_s15 = scalar_lea.vmem %s1054_s16, 256  ;;  %p1056_p12 = scmp.lt.s32.totalorder %s1457_s13, %s1054_s16 }
  0x93   : > { %p1051_p9 = pnand %p1049_p8, %p1035_p7  ;;  %p1057_p4 = scmp.lt.s32.totalorder %s1055_s15, %s1048_s10 }
  0x95   : > { %p1052_p0 = pneg %p1051_p9  ;;  %p1058_p6 = por %p1057_p4, %p1056_p12 }
  0x97   : > { %p1059_p3 = pnand %p1058_p6, %p1052_p0 }
  0x99   : > { %1062 = shalt.err (!%p1059_p3)
}
  0x9a   : > { %839 = dma.hbm_to_vmem [thread:$0]  (!%p1453_p5), %s1449_s14, 128, %s1457_s13, %s302_s1  }
  0x9b   : > { %p1668_p1 = scmp.ne.s32.totalorder %s1657_s8, 0 }
  0x9c   : > { %s1487_s2 = sand.u32 (!%p1668_p1), 1, %s1197_s25  }
  0x9d   : > { %322 = sbr.rel (%p1668_p1) target bundleno = 852 (0x354), region = 40  ;;  %s1490_s19 = sshll.u32 (!%p1668_p1), %s1487_s2, 3 }
  0x9e   : > { %s325_s12 = scalar_lea.sflag (!%p1668_p1), [#allocation3], %s1487_s2  ;;  %s328_s11 = scalar_lea.vmem (!%p1668_p1), [#allocation2], %s1490_s19 }
  0xa4   : > { %1172 = dma.done.wait (%p1426_p11), %s325_s12, 128  }
  0xa5   : > { %1174 = vsyncadd (%p1426_p11), %s325_s12, 4294967168  ;;  %p1669_p12 = scmp.eq.s32.totalorder %s1301_s30, 0 }
  0xa7   : > { %1176 = dma.done.wait (%p1669_p12), [#allocation6], 32   ;;  %p1670_p0 = pmov %p1669_p12 }
  0xa9   : > { %1178 = vsyncadd (%p1670_p0), [#allocation6], 4294967264  ;;  %p1671_p5 = pmov %p1670_p0 }
  0xaa   : > { %p1672_p7 = pmov %p1670_p0 }
  0xab   : > { %1180 = dma.done.wait (%p1671_p5), [#allocation9], 528  }
  0xac   : > { %1182 = vsyncadd (%p1672_p7), [#allocation9], 4294966768  ;;  %vm388_vm0 = vcmask 261120   ;;  %v385_v0 = vld [vmem:[%s328_s11] sm:$0xff]  ;;  %v417_v7 = vld [vmem:[#allocation8] sm:$0xff]  ;;  %v1222_v10 = vmov 0.0|0.0  }
  0xad   : > { %v389_v1 = vsel %vm388_vm0, %v385_v0, 0.0  ;;  %v418_v8 = vld [vmem:[#allocation8 + $0x8] sm:$0xff]  ;;  %v419_v9 = vld [vmem:[#allocation8 + $0x10] sm:$0xff]  ;;  %793 = vmatprep.subr.bf16.mxu0 %v1222_v10  ;;  %v420_v12 = vld [vmem:[#allocation8 + $0x18] sm:$0xff]  ;;  %vm1223_vm1 = vmmov 0   ;;  %v1224_v13 = vmov 0.0  }
  0xae   : > { %390 = vadd.xlane.f32.xlu0 %v389_v1  ;;  %v794_v11 = vpack.c.bf16 %v418_v8, %v417_v7  ;;  %790 = vmatprep.mubr.msk.f32.mxu0 %vm1223_vm1, %v1224_v13  ;;  %v797_v14 = vpack.c.bf16 %v420_v12, %v419_v9  ;;  %v765_v19 = vld [vmem:[#allocation5] ss:$0 sm:$0xff]  ;;  %v766_v21 = vld [vmem:[#allocation7] ss:$0 sm:$0xff]  ;;  %v767_v24 = vld [vmem:[#allocation10] ss:$0 sm:$0xff] }
  0xaf   : > { %s1510_s1 = sshll.u32 %s1205_s27, 7  ;;  %s370_s8 = scalar_lea.vmem [#allocation11], %s1490_s19 }
  0xb0   : > { %795 = vmatpush3.bf16.msra.mxu0 %v794_v11  ;;  %s537_s21 = sshll.u32 %s370_s8, 4  ;;  %s1517_s13 = scalar_lea.hbm %s1648_s5, %s1510_s1  ;;  %s1519_s21 = int_to_ptr.vmem [resolvable:$true] %s537_s21 }
  0xb1   : > { %796 = vmatprep.subr.bf16.mxu0 %v1222_v10  ;;  %s1225_s10 = smov 96   ;;  %s513_s27 = scalar_lea.sflag [#allocation4], %s1487_s2 }
  0xb2   : > { %s1063_s18 = scalar_lea.vmem %s1519_s21, 128  ;;  %p1673_p10 = scmp.ne.s32.totalorder %s1665_s22, 0 }
  0xb3   : > { %p1064_p11 = scmp.ne.s32.totalorder %s1519_s21, %s1063_s18  ;;  %s1226_s16 = smov [#allocation11]  }
  0xb4   : > { %798 = vmatpush3.bf16.msra.mxu0 %v797_v14  ;;  %s1067_s15 = sshll.u32 %s1226_s16, 4  ;;  %s1068_s15 = int_to_ptr.vmem [resolvable:$false] %s1067_s15 }
  0xb5   : > { %p1065_p13 = pnand %p1064_p11, %p1673_p10  ;;  %s1069_s12 = scalar_lea.vmem %s1068_s15, 256 }
  0xb6   : > { %p1070_p8 = scmp.lt.s32.totalorder %s1519_s21, %s1068_s15  ;;  %p1071_p9 = scmp.lt.s32.totalorder %s1069_s12, %s1063_s18 }
  0xb7   : > { %p1066_p2 = pneg %p1065_p13 }
  0xb8   : > { %p1072_p4 = por %p1071_p9, %p1070_p8 }
  0xba   : > { %p1073_p6 = pnand %p1072_p4, %p1066_p2 }
 0x13b   : > { %v391_v2 = vpop.xlane.xlu0 %390 }
 0x13c   : > { %v393_v3 = vmul.f32 0.03125, %v391_v2 }
 0x13e   : > { %v394_v4 = vsub.f32 %v385_v0, %v393_v3 }
 0x140   : > { %v395_v5 = vmul.f32 %v394_v4, %v394_v4 }
 0x142   : > { %v396_v6 = vsel %vm388_vm0, %v395_v5, 0.0 }
 0x143   : > { %397 = vadd.xlane.f32.xlu0 %v396_v6 }
 0x1d0   : > { %v398_v15 = vpop.xlane.xlu0 %397 }
 0x1d1   : > { %v399_v16 = vmul.f32 0.03125, %v398_v15 }
 0x1d3   : > { %v400_v17 = vadd.f32 1e-05, %v399_v16 }
 0x1d5   : > { %919 = vrsqrt.f32 %v400_v17 }
 0x1df   : > { %v920_v18 = vpop.eup %919 }
 0x1e0   : > { %v402_v20 = vmul.f32 %v920_v18, %v394_v4 }
 0x1e2   : > { %v409_v22 = vmul.f32 %v765_v19, %v402_v20 }
 0x1e4   : > { %v416_v23 = vadd.f32 %v766_v21, %v409_v22 }
 0x1e6   : > { %791 = vmatmul.mubr.msk.f32.vlgmr.msra.gmra.mrb[0].mxu0 %vm388_vm0, %v416_v23 }
 0x2b9   : > { %v497_v25 = vpop.f32.mrb[0].mxu0 }
 0x2ba   : > { %v498_v26 = vadd.f32 %v767_v24, %v497_v25  ;;  %v792_v27 = vpop.f32.mrb[1].mxu0 }
 0x2bc   : > { %503 = vrot.lane.b32.xlu1 %v498_v26, %s1225_s10  ;;  %501 = vst.msk [vmem:[%s370_s8] sm:$0xff] %vm388_vm0, %v498_v26 }
 0x2bd   : > { %1076 = shalt.err (!%p1073_p6)
}
 0x2be   : > { %s1077_s2 = scalar_lea.hbm %s1517_s13, 128  ;;  %s1081_s20 = scalar_lea.hbm %s1648_s5, 256 }
 0x2bf   : > { %p1078_p3 = scmp.ne.s32.totalorder %s1517_s13, %s1077_s2  ;;  %p1082_p0 = scmp.lt.u32.totalorder %s1517_s13, %s1648_s5 }
 0x2c0   : > { %p1083_p5 = scmp.lt.u32.totalorder %s1081_s20, %s1077_s2  ;;  %p1085_p11 = scmp.lt.u32.totalorder %s1077_s2, %s1517_s13 }
 0x2c1   : > { %p1079_p1 = pnand %p1078_p3, %p1673_p10 }
 0x2c2   : > { %p1084_p7 = por %p1083_p5, %p1082_p0 }
 0x2c3   : > { %p1080_p12 = pneg %p1079_p1 }
 0x2c4   : > { %p1086_p13 = por %p1085_p11, %p1084_p7 }
 0x2c6   : > { %p1087_p2 = pnand %p1086_p13, %p1080_p12 }
 0x2c8   : > { %1090 = shalt.err (!%p1087_p2)
}
 0x2c9   : > { %817 = dma.vmem_to_hbm [thread:$0]  (%p1673_p10), %s1519_s21, 128, %s1517_s13, %s513_s27   ;;  %vm506_vm2 = vcmask 130048  }
 0x2ca   : > { %s1227_s18 = smov 80   ;;  %s517_s16 = sand.u32 1, %s1301_s30  }
 0x2cb   : > { %508 = vrot.lane.b32.xlu1 %v498_v26, %s1227_s18  ;;  %s377_s15 = scalar_lea.vmem [#allocation12], %s1490_s19  ;;  %s1550_s8 = scalar_lea.hbm %s1649_s6, %s1510_s1 }
 0x2cc   : > { %s551_s12 = sshll.u32 %s377_s15, 4  ;;  %s384_s20 = scalar_lea.vmem [#allocation14], %s1490_s19  ;;  %s1552_s12 = int_to_ptr.vmem [resolvable:$true] %s551_s12 }
 0x2cd   : > { %s1557_s21 = sshll.u32 %s384_s20, 4  ;;  %s1560_s30 = scalar_lea.sflag [#allocation13], %s517_s16  ;;  %s1591_s21 = int_to_ptr.vmem [resolvable:$true] %s1557_s21 }
 0x2ce   : > { %s1091_s13 = scalar_lea.vmem %s1552_s12, 128  ;;  %s1228_s27 = smov [#allocation12]  }
 0x2cf   : > { %p1092_p8 = scmp.ne.s32.totalorder %s1552_s12, %s1091_s13  ;;  %s1095_s14 = sshll.u32 %s1228_s27, 4  ;;  %s1096_s14 = int_to_ptr.vmem [resolvable:$false] %s1095_s14 }
 0x2d0   : > { %s1097_s10 = scalar_lea.vmem %s1096_s14, 256  ;;  %p1098_p6 = scmp.lt.s32.totalorder %s1552_s12, %s1096_s14 }
 0x2d1   : > { %p1093_p9 = pnand %p1092_p8, %p1673_p10  ;;  %p1099_p3 = scmp.lt.s32.totalorder %s1097_s10, %s1091_s13 }
 0x2d3   : > { %p1094_p4 = pneg %p1093_p9  ;;  %p1100_p1 = por %p1099_p3, %p1098_p6 }
 0x2d5   : > { %p1101_p12 = pnand %p1100_p1, %p1094_p4 }
 0x32e   : > { %v504_v28 = vpop.permute.xlu1 %503 }
 0x32f   : > { %507 = vst.msk [vmem:[%s377_s15] sm:$0xff] %vm506_vm2, %v504_v28 }
 0x330   : > { %1104 = shalt.err (!%p1101_p12)
}
 0x331   : > { %s1105_s18 = scalar_lea.hbm %s1550_s8, 128  ;;  %s1109_s2 = scalar_lea.hbm %s1649_s6, 256 }
 0x332   : > { %p1106_p0 = scmp.ne.s32.totalorder %s1550_s8, %s1105_s18  ;;  %p1110_p11 = scmp.lt.u32.totalorder %s1550_s8, %s1649_s6 }
 0x333   : > { %p1111_p13 = scmp.lt.u32.totalorder %s1109_s2, %s1105_s18  ;;  %p1113_p8 = scmp.lt.u32.totalorder %s1105_s18, %s1550_s8 }
 0x334   : > { %p1107_p5 = pnand %p1106_p0, %p1673_p10 }
 0x335   : > { %p1112_p2 = por %p1111_p13, %p1110_p11 }
 0x336   : > { %p1108_p7 = pneg %p1107_p5 }
 0x337   : > { %p1114_p9 = por %p1113_p8, %p1112_p2 }
 0x339   : > { %p1115_p4 = pnand %p1114_p9, %p1108_p7 }
 0x33b   : > { %1118 = shalt.err (!%p1115_p4)
}
 0x33c   : > { %818 = dma.vmem_to_hbm [thread:$0]  (%p1673_p10), %s1552_s12, 128, %s1550_s8, %s1560_s30  }
 0x33d   : > { %s1588_s10 = scalar_lea.hbm %s1650_s7, %s1510_s1  ;;  %v509_v29 = vpop.permute.xlu1 %508  ;;  %s1119_s18 = scalar_lea.vmem %s1591_s21, 128 }
 0x33e   : > { %511 = vst.msk [vmem:[%s384_s20] sm:$0xff] %vm506_vm2, %v509_v29  ;;  %p1120_p6 = scmp.ne.s32.totalorder %s1591_s21, %s1119_s18  ;;  %s1229_s12 = smov [#allocation14]  }
 0x33f   : > { %s1123_s8 = sshll.u32 %s1229_s12, 4  ;;  %s1124_s8 = int_to_ptr.vmem [resolvable:$false] %s1123_s8 }
 0x340   : > { %p1121_p3 = pnand %p1120_p6, %p1673_p10  ;;  %s1125_s16 = scalar_lea.vmem %s1124_s8, 256 }
 0x341   : > { %p1126_p12 = scmp.lt.s32.totalorder %s1591_s21, %s1124_s8  ;;  %p1127_p0 = scmp.lt.s32.totalorder %s1125_s16, %s1119_s18 }
 0x342   : > { %p1122_p1 = pneg %p1121_p3 }
 0x343   : > { %p1128_p5 = por %p1127_p0, %p1126_p12 }
 0x345   : > { %p1129_p7 = pnand %p1128_p5, %p1122_p1 }
 0x347   : > { %1132 = shalt.err (!%p1129_p7)
}
 0x348   : > { %s1133_s19 = scalar_lea.hbm %s1588_s10, 128  ;;  %s1137_s15 = scalar_lea.hbm %s1650_s7, 256 }
 0x349   : > { %p1134_p11 = scmp.ne.s32.totalorder %s1588_s10, %s1133_s19  ;;  %p1138_p8 = scmp.lt.u32.totalorder %s1588_s10, %s1650_s7 }
 0x34a   : > { %p1139_p9 = scmp.lt.u32.totalorder %s1137_s15, %s1133_s19  ;;  %p1141_p6 = scmp.lt.u32.totalorder %s1133_s19, %s1588_s10 }
 0x34b   : > { %p1135_p13 = pnand %p1134_p11, %p1673_p10 }
 0x34c   : > { %p1140_p4 = por %p1139_p9, %p1138_p8 }
 0x34d   : > { %p1136_p2 = pneg %p1135_p13 }
 0x34e   : > { %p1142_p3 = por %p1141_p6, %p1140_p4 }
 0x350   : > { %p1143_p1 = pnand %p1142_p3, %p1136_p2 }
 0x352   : > { %1146 = shalt.err (!%p1143_p1)
}
 0x353   : > { %819 = dma.vmem_to_hbm [thread:$0]  (%p1673_p10), %s1591_s21, 128, %s1588_s10, %s1560_s30  }
 0x354 PF: > { %s577_s27 = sand.u32 1, %s1193_s24   ;;  %p1674_p12 = scmp.ne.s32.totalorder %s1666_s9, 0 }
 0x355   : > { %p1675_p0 = scmp.ge.s32.totalorder %s1213_s29, 2  ;;  %s578_s13 = scalar_lea.sflag [#allocation4], %s577_s27 }
 0x357   : > { %p841_p5 = pnand %p1675_p0, %p1674_p12 }
 0x359   : > { %1184 = dma.done.wait (!%p841_p5), %s578_s13, 128  }
 0x35a   : > { %1186 = vsyncadd (!%p841_p5), %s578_s13, 4294967168  ;;  %s1676_s14 = sadd.s32 4294967294, %s1213_s29  }
 0x35b   : > { %s586_s18 = sand.u32 1, %s1676_s14  }
 0x35c   : > { %s587_s12 = scalar_lea.sflag [#allocation13], %s586_s18 }
 0x35d   : > { %1188 = dma.done.wait (!%p841_p5), %s587_s12, 256  }
 0x35e   : > { %1190 = vsyncadd (!%p841_p5), %s587_s12, 4294967040  ;;  %s29_s29 = sadd.s32 1, %s1213_s29   ;;  %s1677_s24 = smov %s1197_s25 }
 0x35f   : > { %p26_p10 = scmp.ge.s32.totalorder %s29_s29, 4   ;;  %s1678_s25 = smov %s1201_s26 }
 0x360   : > { %s1679_s26 = smov %s1437_s23  ;;  %s1680_s27 = smov %s1209_s28 }
 0x361   : > { %s1681_s28 = smov %s1683_s17  ;;  %28 = sbr.rel (!%p26_p10) target bundleno = 13 (0xd), region = 133 }
 0x368   :  { %601 = vsyncpa [#allocation3], 1 }
 0x369   :  { %603 = vsyncpa [#allocation3 + $0x1], 1 }
 0x36a   :  { %604 = vsyncpa [#allocation6], 1 }
 0x36b   :  { %605 = vsyncpa [#allocation9], 1 }
 0x36c   :  { %606 = vsyncpa [#allocation4], 1 }
 0x36d   :  { %608 = vsyncpa [#allocation4 + $0x1], 1 }
 0x36e   :  { %609 = vsyncpa [#allocation13], 1 }
 0x36f   :  { %611 = vsyncpa [#allocation13 + $0x1], 1 }

</bundles_post_ra>
